<compile_context>
chip_gen: v5e
topology: v5e:2x2
jax: 0.10.0
libtpu: 0.0.40
codegen_flags: <defaults>
</compile_context>

<pallas_src>
import jax
import jax.numpy as jnp
from jax.experimental import pallas as pl
from jax.experimental.pallas import tpu as pltpu


def attention_kernel(x_ref, w1_ref, b1_ref, w2_ref, b2_ref, o_ref):
    # x_ref : (TB, T, H) f32       w1_ref: (H, A) bf16
    # b1_ref: (1, A)    f32        w2_ref: (1, A) f32      b2_ref: (1, 1) f32
    # o_ref : (TB, H)   f32
    TB, T, H = x_ref.shape
    A = w1_ref.shape[1]

    x = x_ref[...]                                        # (TB, T, H) f32

    # linear1 on the MXU: cast to bf16 right before the dot (block-local copy
    # only), f32 accumulation, large M = TB*T.
    x2d = x.astype(jnp.bfloat16).reshape(TB * T, H)
    h = jnp.dot(x2d, w1_ref[...], preferred_element_type=jnp.float32)
    h = jax.nn.sigmoid(h + b1_ref[...])                   # (TB*T, A) f32 (VPU + EUP)

    # linear2 (out_features == 1): VPU multiply + lane reduce instead of an
    # N=1 MXU matmul.  Scores land as (TB, T) with T on the lane axis.
    # (b2 is a constant shift that cancels in the softmax; kept for fidelity.)
    s = jnp.sum(h.reshape(TB, T, A) * w2_ref[...], axis=-1) + b2_ref[...]   # (TB, T)

    # softmax over T (last / lane axis -> dense vregs); exact divide so alpha
    # sums to 1 (no approx-reciprocal bias).
    m = jnp.max(s, axis=-1, keepdims=True)
    e = jnp.exp(s - m)
    alpha = e / jnp.sum(e, axis=-1, keepdims=True)        # (TB, T) f32

    # weighted sum over time: broadcast multiply (VPU) + sublane reduce on the
    # f32 block itself (no extra full-slab cast), accumulate in f32.
    o_ref[...] = jnp.sum(x * alpha[:, :, None], axis=1).astype(o_ref.dtype)


def _vmem_capacity_bytes():
    """Per-core VMEM capacity; conservative 64 MiB (v7x) fallback."""
    try:
        info = pltpu.get_tpu_info()
        cap = getattr(info, "vmem_capacity_bytes", None)
        if cap:
            return int(cap)
    except Exception:
        pass
    return 64 << 20


def _choose_batch_tile(B, T, H, A, budget_bytes):
    """Pick the batch tile TB from a VMEM budget that accounts for the real
    in-kernel footprint (not just the double-buffered input block)."""
    per_row = (2 * T * H * 4        # f32 x block, double-buffered by the pipeline
               + T * H * 2          # bf16 cast fed to the MXU
               + T * H * 4          # weighted-sum product temporary
               + 2 * T * A * 4      # h (+ sigmoid temporary)
               + 2 * H * 4          # output rows, double-buffered
               + 4 * T * 4)         # scores / softmax temporaries
    per_row = int(per_row * 1.25)   # headroom for spills / fragmentation
    tb_max = max(1, min(B, budget_bytes // per_row))

    # Prefer >= 4 grid steps (>= 2 per TC on v7x megacore) when that still
    # allows an 8-row (sublane-aligned) tile; otherwise fewer, larger steps.
    tb_pref = min(tb_max, max(8, pl.cdiv(B, 4)))

    def _ok(tb):
        # Output block (tb, H): second-to-last dim must be 8-aligned or full B.
        return tb == B or tb % 8 == 0

    # Largest tb <= tb_pref that divides B -> no padding, no partial blocks.
    for tb in range(min(tb_pref, B), 0, -1):
        if B % tb == 0 and _ok(tb):
            return tb
    # Otherwise the largest aligned tb that fits; Pallas masks the ragged last
    # block (rows are independent, OOB writes are dropped).
    for tb in range(min(tb_max, B), 0, -1):
        if _ok(tb):
            return tb
    return min(B, tb_max)


def attention_forward(x, w1, b1, w2, b2, *, batch_tile=None):
    """x: (B, T, H).  PyTorch nn.Linear layouts: w1 (A, H), b1 (A,), w2 (1, A), b2 (1,)."""
    B, T, H = x.shape
    A = w1.shape[0]

    # Generation-aware VMEM budget: ~70% of per-core VMEM, capped at 96 MiB
    # (v5e/v6e: ~90 MiB of 128 MiB; v7x: ~45 MiB of 64 MiB; fallback: 45 MiB).
    budget = min(int(_vmem_capacity_bytes() * 0.7), 96 << 20)

    tb = batch_tile if batch_tile is not None else _choose_batch_tile(B, T, H, A, budget)
    grid = (pl.cdiv(B, tb),)

    # Weights are tiny: a one-time bf16 cast / transpose of w1 is negligible.
    w1_t = jnp.asarray(w1, jnp.bfloat16).T           # (H, A)
    b1_r = jnp.asarray(b1, jnp.float32).reshape(1, A)
    w2_r = jnp.asarray(w2, jnp.float32).reshape(1, A)
    b2_r = jnp.asarray(b2, jnp.float32).reshape(1, 1)

    return pl.pallas_call(
        attention_kernel,
        out_shape=jax.ShapeDtypeStruct((B, H), jnp.float32),
        grid_spec=pltpu.PrefetchScalarGridSpec(
            num_scalar_prefetch=0,
            grid=grid,
            in_specs=[
                pl.BlockSpec((tb, T, H), lambda i: (i, 0, 0)),   # batch-tiled x slab (f32)
                pl.BlockSpec((H, A), lambda i: (0, 0)),          # w1 (resident, bf16)
                pl.BlockSpec((1, A), lambda i: (0, 0)),          # b1
                pl.BlockSpec((1, A), lambda i: (0, 0)),          # w2 row
                pl.BlockSpec((1, 1), lambda i: (0, 0)),          # b2
            ],
            out_specs=pl.BlockSpec((tb, H), lambda i: (i, 0)),
        ),
        compiler_params=pltpu.CompilerParams(
            dimension_semantics=("parallel",),        # batch tiles shard across TCs
            vmem_limit_bytes=budget),
    )(x, w1_t, b1_r, w2_r, b2_r)


def attention_reference(x, w1, b1, w2, b2):
    B, T, H = x.shape
    xf = x.reshape(-1, H)
    v = jax.nn.sigmoid(xf @ w1.T + b1)
    s = (v @ w2.T + b2).reshape(B, T)
    a = jax.nn.softmax(s, axis=-1)[..., None]
    return jnp.sum(x * a, axis=1)


if __name__ == "__main__":
    B, T, H, A = 16, 8, 32, 16   # batch, time steps, hidden_size, attention_size

    key = jax.random.PRNGKey(0)
    kx, k1, k2, k3, k4 = jax.random.split(key, 5)

    x = jax.random.normal(kx, (B, T, H), dtype=jnp.float32)
    # Deterministic synthetic parameters (PyTorch nn.Linear layout: (out, in)).
    w1 = jax.random.normal(k1, (A, H), dtype=jnp.float32) * 0.1
    b1 = jax.random.normal(k2, (A,), dtype=jnp.float32) * 0.1
    w2 = jax.random.normal(k3, (1, A), dtype=jnp.float32) * 0.1
    b2 = jax.random.normal(k4, (1,), dtype=jnp.float32) * 0.1

    out = attention_forward(x, w1, b1, w2, b2)
    out = jax.block_until_ready(out)

    ref = attention_reference(x, w1, b1, w2, b2)
    assert out.shape == (B, H), out.shape
    # linear1 runs with bf16 MXU inputs (f32 accumulation); everything else is f32.
    max_err = jnp.max(jnp.abs(out - ref))
    assert jnp.allclose(out, ref, atol=1e-2, rtol=1e-2), f"max abs err {max_err}"

    print("KERNEL_OK")
</pallas_src>

<mosaic_0001>
module attributes {stable_mosaic.version = 11 : i64} {
  func.func @attention_kernel(%arg0: i32, %arg1: memref<8x8x32xf32, #tpu.memory_space<vmem>>, %arg2: memref<32x16xbf16, #tpu.memory_space<vmem>>, %arg3: memref<1x16xf32, #tpu.memory_space<vmem>>, %arg4: memref<1x16xf32, #tpu.memory_space<vmem>>, %arg5: memref<1x1xf32, #tpu.memory_space<vmem>>, %arg6: memref<8x32xf32, #tpu.memory_space<vmem>>) attributes {dimension_semantics = [#tpu.dimension_semantics<parallel>], iteration_bounds = array<i64: 2>, scalar_prefetch = 0 : i64, scratch_operands = 0 : i64, tpu.core_type = #tpu.core_type<tc>, window_params = [{transform_indices = @transform_0, window_bounds = array<i64: 8, 8, 32>}, {pipeline_mode = #tpu.pipeline_mode<synchronous>, transform_indices = @transform_1, window_bounds = array<i64: 32, 16>}, {pipeline_mode = #tpu.pipeline_mode<synchronous>, transform_indices = @transform_2, window_bounds = array<i64: 1, 16>}, {pipeline_mode = #tpu.pipeline_mode<synchronous>, transform_indices = @transform_3, window_bounds = array<i64: 1, 16>}, {pipeline_mode = #tpu.pipeline_mode<synchronous>, transform_indices = @transform_4, window_bounds = array<i64: 1, 1>}, {transform_indices = @transform_5, window_bounds = array<i64: 8, 32>}]} {
    %c0 = arith.constant 0 : index
    %c0_0 = arith.constant 0 : index
    %c0_1 = arith.constant 0 : index
    %0 = vector.load %arg1[%c0, %c0_0, %c0_1] : memref<8x8x32xf32, #tpu.memory_space<vmem>>, vector<8x8x32xf32>
    %1 = arith.truncf %0 : vector<8x8x32xf32> to vector<8x8x32xbf16>
    %2 = vector.shape_cast %1 : vector<8x8x32xbf16> to vector<64x32xbf16>
    %c0_2 = arith.constant 0 : index
    %c0_3 = arith.constant 0 : index
    %3 = vector.load %arg2[%c0_2, %c0_3] : memref<32x16xbf16, #tpu.memory_space<vmem>>, vector<32x16xbf16>
    %cst = arith.constant dense<0.000000e+00> : vector<64x16xf32>
    %4 = tpu.matmul %2, %3, %cst {dimension_numbers = #tpu.dot_dimension_numbers<[1], [0], [0], [1], [0, 0, 1, 1], [], []>} : vector<64x32xbf16>, vector<32x16xbf16>, vector<64x16xf32> -> vector<64x16xf32>
    %c0_4 = arith.constant 0 : index
    %c0_5 = arith.constant 0 : index
    %5 = vector.load %arg3[%c0_4, %c0_5] : memref<1x16xf32, #tpu.memory_space<vmem>>, vector<1x16xf32>
    %6 = vector.broadcast %5 : vector<1x16xf32> to vector<64x16xf32>
    %7 = arith.addf %4, %6 : vector<64x16xf32>
    %8 = arith.negf %7 : vector<64x16xf32>
    %9 = math.exp %8 : vector<64x16xf32>
    %cst_6 = arith.constant 1.000000e+00 : f32
    %10 = vector.broadcast %cst_6 : f32 to vector<64x16xf32>
    %11 = arith.addf %10, %9 : vector<64x16xf32>
    %12 = arith.divf %10, %11 : vector<64x16xf32>
    %13 = vector.shape_cast %12 : vector<64x16xf32> to vector<8x8x16xf32>
    %c0_7 = arith.constant 0 : index
    %c0_8 = arith.constant 0 : index
    %14 = vector.load %arg4[%c0_7, %c0_8] : memref<1x16xf32, #tpu.memory_space<vmem>>, vector<1x16xf32>
    %15 = vector.shape_cast %14 : vector<1x16xf32> to vector<1x1x16xf32>
    %16 = vector.broadcast %15 : vector<1x1x16xf32> to vector<8x8x16xf32>
    %17 = arith.mulf %13, %16 : vector<8x8x16xf32>
    %cst_9 = arith.constant dense<0.000000e+00> : vector<8x8xf32>
    %18 = vector.multi_reduction <add>, %17, %cst_9 [2] : vector<8x8x16xf32> to vector<8x8xf32>
    %c0_10 = arith.constant 0 : index
    %c0_11 = arith.constant 0 : index
    %19 = vector.load %arg5[%c0_10, %c0_11] : memref<1x1xf32, #tpu.memory_space<vmem>>, vector<1x1xf32>
    %20 = vector.broadcast %19 : vector<1x1xf32> to vector<8x8xf32>
    %21 = arith.addf %18, %20 : vector<8x8xf32>
    %cst_12 = arith.constant dense<0xFF800000> : vector<8xf32>
    %22 = vector.multi_reduction <maximumf>, %21, %cst_12 [1] : vector<8x8xf32> to vector<8xf32>
    %23 = vector.shape_cast %22 : vector<8xf32> to vector<8x1xf32>
    %24 = vector.broadcast %23 : vector<8x1xf32> to vector<8x8xf32>
    %25 = arith.subf %21, %24 : vector<8x8xf32>
    %26 = math.exp %25 : vector<8x8xf32>
    %cst_13 = arith.constant dense<0.000000e+00> : vector<8xf32>
    %27 = vector.multi_reduction <add>, %26, %cst_13 [1] : vector<8x8xf32> to vector<8xf32>
    %28 = vector.shape_cast %27 : vector<8xf32> to vector<8x1xf32>
    %29 = vector.broadcast %28 : vector<8x1xf32> to vector<8x8xf32>
    %30 = arith.divf %26, %29 : vector<8x8xf32>
    %31 = vector.shape_cast %30 : vector<8x8xf32> to vector<8x8x1xf32>
    %32 = vector.broadcast %31 : vector<8x8x1xf32> to vector<8x8x32xf32>
    %33 = arith.mulf %0, %32 : vector<8x8x32xf32>
    %cst_14 = arith.constant dense<0.000000e+00> : vector<8x32xf32>
    %34 = vector.multi_reduction <add>, %33, %cst_14 [1] : vector<8x8x32xf32> to vector<8x32xf32>
    %c0_15 = arith.constant 0 : index
    %c0_16 = arith.constant 0 : index
    %35 = vector.load %arg6[%c0_15, %c0_16] : memref<8x32xf32, #tpu.memory_space<vmem>>, vector<8x32xf32>
    tpu.vector_store %arg6[%c0_15, %c0_16], %34 {strides = array<i32>} : memref<8x32xf32, #tpu.memory_space<vmem>>, vector<8x32xf32>,
    return
  }
  func.func @transform_0(%arg0: i32) -> (i32, i32, i32) {
    %c0_i32 = arith.constant 0 : i32
    %c0_i32_0 = arith.constant 0 : i32
    %c0_i32_1 = arith.constant 0 : i32
    return %arg0, %c0_i32, %c0_i32_0 : i32, i32, i32
  }
  func.func @transform_1(%arg0: i32) -> (i32, i32) {
    %c0_i32 = arith.constant 0 : i32
    %c0_i32_0 = arith.constant 0 : i32
    %c0_i32_1 = arith.constant 0 : i32
    return %c0_i32, %c0_i32_0 : i32, i32
  }
  func.func @transform_2(%arg0: i32) -> (i32, i32) {
    %c0_i32 = arith.constant 0 : i32
    %c0_i32_0 = arith.constant 0 : i32
    %c0_i32_1 = arith.constant 0 : i32
    return %c0_i32, %c0_i32_0 : i32, i32
  }
  func.func @transform_3(%arg0: i32) -> (i32, i32) {
    %c0_i32 = arith.constant 0 : i32
    %c0_i32_0 = arith.constant 0 : i32
    %c0_i32_1 = arith.constant 0 : i32
    return %c0_i32, %c0_i32_0 : i32, i32
  }
  func.func @transform_4(%arg0: i32) -> (i32, i32) {
    %c0_i32 = arith.constant 0 : i32
    %c0_i32_0 = arith.constant 0 : i32
    %c0_i32_1 = arith.constant 0 : i32
    return %c0_i32, %c0_i32_0 : i32, i32
  }
  func.func @transform_5(%arg0: i32) -> (i32, i32) {
    %c0_i32 = arith.constant 0 : i32
    %c0_i32_0 = arith.constant 0 : i32
    return %arg0, %c0_i32 : i32, i32
  }
}

</mosaic_0001>

<bundles_post_ra>
// kernel: tpu_custom_call.1
= control target key start
LH: loop header
LB: loop body
LE: loop exit
PB: predicated region body
PF: predicated region fallthrough
CT: control target
= control target key end

     0   :  { %s1806_s0 = inlined_call_operand.hbm [shape: f32[16,8,32], index: 0, kind: input, shape index: {}]   ;;  %s1807_s1 = inlined_call_operand.vmem [shape: bf16[32,16], index: 1, kind: input, shape index: {}]   ;;  %s1808_s2 = inlined_call_operand.vmem [shape: f32[1,16], index: 2, kind: input, shape index: {}]   ;;  %s1809_s3 = inlined_call_operand.vmem [shape: f32[1,16], index: 3, kind: input, shape index: {}]   ;;  %s1810_s4 = inlined_call_operand.<no memory space> [shape: f32[1,1], index: 4, kind: input, shape index: {}]   ;;  %s1811_s5 = inlined_call_operand.hbm [shape: f32[16,32], index: 5, kind: output, shape index: {}]  }
   0x1   :  { %v10_v0 = vstv %s1810_s4 }
   0x2   :  { %11 = vst [vmem:[#allocation2] sm:$0x1] %v10_v0 }
   0x3   :  { %12 = vsyncpa [#allocation4], 0 }
   0x4   :  { %14 = vsyncpa [#allocation4 + $0x1], 0 }
   0x5   :  { %15 = vsyncpa [#allocation5], 0 }
   0x6   :  { %17 = vsyncpa [#allocation5 + $0x1], 0  ;;  %s1326_s20 = smov 0   ;;  %s1328_s21 = smov 0  }
   0x7   :  { %s1330_s22 = smov 0   ;;  %s1332_s23 = smov 0  }
   0x8 LB: > { %s1347_s4 = sadd.s32 4294967295, %s1288_s23   ;;  %s1024_s24 = sadd.s32 4294967294, %s1288_s23   ;;  %s1288_s23 = sphi %s1332_s23, %s1841_s23   ;;  %s1284_s22 = sphi %s1330_s22, %s1840_s22   ;;  %s1280_s21 = sphi %s1328_s21, %s1839_s21   ;;  %s1276_s20 = sphi %s1326_s20, %s1838_s20  }
   0x9   : > { %s1351_s25 = sadd.s32 1, %s1288_s23   ;;  %s30_s26 = sadd.s32 1, %s1284_s22 }
   0xa   : > { %s27_s27 = ssub.s32 %s1288_s23, %s1351_s25  ;;  %p37_p0 = scmp.ne.s32.totalorder %s1284_s22, %s1280_s21 }
   0xb   : > { %p28_p1 = scmp.eq.s32.totalorder %s27_s27, 0  ;;  %p38_p2 = scmp.eq.s32.totalorder %s1288_s23, 0 }
   0xc   : > { %p43_p3 = scmp.ne.s32.totalorder %s1280_s21, %s1276_s20  ;;  %p44_p4 = scmp.eq.s32.totalorder %s1347_s4, 0 }
   0xd   : > { %s1363_s28 = scalar_select %p28_p1, %s1284_s22, %s30_s26  }
   0xe   : > { %p1365_p5 = por %p38_p2, %p37_p0  ;;  %p1369_p6 = por %p44_p4, %p43_p3 }
   0xf   : > { %p151_p7 = scmp.eq.s32.totalorder %s1347_s4, 1  ;;  %p157_p8 = scmp.eq.s32.totalorder %s1024_s24, 1 }
  0x10   : > { %p1078_p10 = scmp.lt.s32.totalorder %s1288_s23, 2  ;;  %s189_s8 = sand.u32 1, %s1284_s22  }
  0x11   : > { %p1376_p11 = por %p151_p7, %p37_p0  ;;  %p1380_p12 = por %p157_p8, %p43_p3 }
  0x12   : > { %s1057_s9 = sshll.u32 %s1288_s23, 6  ;;  %s1027_s10 = sshll.u32 %s189_s8, 6 }
  0x13   : > { %s198_s13 = scalar_lea.hbm %s1806_s0, %s1057_s9  ;;  %s193_s15 = scalar_lea.vmem [#allocation3], %s1027_s10 }
  0x14   : > { %s199_s14 = sshll.u32 %s198_s13, 4  ;;  %s201_s16 = sshll.u32 %s193_s15, 4  ;;  %s200_s14 = int_to_ptr.hbm [resolvable:$true] %s199_s14  ;;  %s202_s16 = int_to_ptr.vmem [resolvable:$true] %s201_s16 }
  0x15   : > { %p1391_p13 = pnand %p1078_p10, %p1365_p5  ;;  %p1030_p0 = scmp.ge.s32.totalorder %s1288_s23, 1 }
  0x16   : > { %p209_p1 = scmp.lt.s32.totalorder %s1288_s23, 3  ;;  %s190_s18 = scalar_lea.sflag [#allocation4], %s189_s8 }
  0x17   : > { %s1192_s19 = sshra.s32 %s200_s14, 4  ;;  %p1196_p3 = pneg %p1391_p13  ;;  %s1193_s19 = int_to_ptr.hbm [resolvable:$true] %s1192_s19 }
  0x18   : > { %s1194_s24 = scalar_lea.hbm %s1193_s19, 64  ;;  %s1199_s29 = scalar_lea.hbm %s1806_s0, 128 }
  0x19   : > { %p1195_p2 = scmp.ne.s32.totalorder %s1193_s19, %s1194_s24  ;;  %p1200_p5 = scmp.lt.s32.totalorder %s1193_s19, %s1806_s0 }
  0x1a   : > { %p1201_p8 = scmp.lt.s32.totalorder %s1199_s29, %s1194_s24 }
  0x1b   : > { %p1197_p4 = pnand %p1196_p3, %p1195_p2 }
  0x1c   : > { %p1202_p10 = por %p1201_p8, %p1200_p5 }
  0x1d   : > { %p1198_p7 = pneg %p1197_p4 }
  0x1f   : > { %p1203_p9 = pnand %p1202_p10, %p1198_p7 }
  0x21   : > { %1206 = shalt.err (!%p1203_p9)
}
  0x22   : > { %s1290_s8 = smov 128   ;;  %s1291_s11 = smov 8  }
  0x23   : > { %1073 = dma.hbm_to_vmem [thread:$0]  (!%p1391_p13), %s200_s14, 1024, %s202_s16, %s190_s18, %s1290_s8, %s1290_s8, %s1291_s11  }
  0x24   : > { %p210_p2 = pnand %p1030_p0, %p209_p1 }
  0x25   : > { %s1412_s12 = sand.u32 (!%p210_p2), 1, %s1280_s21  }
  0x26   : > { %213 = sbr.rel (%p210_p2) target bundleno = 934 (0x3a6), region = 40  ;;  %s1031_s13 = sshll.u32 (!%p210_p2), %s1412_s12, 6 }
  0x27   : > { %s216_s15 = scalar_lea.sflag (!%p210_p2), [#allocation4], %s1412_s12  ;;  %s1416_s19 = scalar_lea.vmem (!%p210_p2), [#allocation3], %s1031_s13 }
  0x2b   : > { %1267 = dma.done.wait (%p1369_p6), %s216_s15, 1024  }
  0x2c   : > { %1269 = vsyncadd (%p1369_p6), %s216_s15, 4294966272  ;;  %v1059_v1 = vld [vmem:[%s1807_s1 + $0x8] sm:$0xff]  ;;  %v1058_v2 = vld [vmem:[%s1807_s1] sm:$0xff]  ;;  %vm305_vm0 = vcmask 261120   ;;  %vm511_vm3 = vcmask 130048   ;;  %s1032_s29 = sshll.u32 %s1412_s12, 3 }
  0x2d   : > { %v249_v3 = vld [vmem:[%s1416_s19] sm:$0xff]  ;;  %v250_v4 = vld [vmem:[%s1416_s19 + $0x8] sm:$0xff]  ;;  %v251_v6 = vld [vmem:[%s1416_s19 + $0x10] sm:$0xff]  ;;  %324 = vmatpush.bf16.msra.mxu0 %v1059_v1  ;;  %1060 = vmatpush.bf16.msra.mxu1 %v1059_v1  ;;  %s1054_s9 = sshll.u32 %s1347_s4, 3  ;;  %s246_s4 = scalar_lea.vmem [#allocation6], %s1032_s29 }
  0x2e   : > { %v257_v5 = vpack.c.bf16 %v249_v3, %v249_v3  ;;  %v252_v7 = vld [vmem:[%s1416_s19 + $0x18] sm:$0xff]  ;;  %v258_v8 = vpack.c.bf16 %v250_v4, %v250_v4  ;;  %v259_v9 = vpack.c.bf16 %v251_v6, %v251_v6  ;;  %v253_v11 = vld [vmem:[%s1416_s19 + $0x20] sm:$0xff]  ;;  %v254_v12 = vld [vmem:[%s1416_s19 + $0x28] sm:$0xff]  ;;  %1061 = vmatpush.bf16.msra.mxu2 %v1059_v1  ;;  %1062 = vmatpush.bf16.msra.mxu3 %v1059_v1  ;;  %s949_s11 = scalar_lea.hbm %s1811_s5, %s1054_s9  ;;  %s951_s13 = sshll.u32 %s246_s4, 4  ;;  %s952_s13 = int_to_ptr.vmem [resolvable:$true] %s951_s13 }
  0x2f   : > { %v260_v10 = vpack.c.bf16 %v252_v7, %v252_v7  ;;  %v255_v13 = vld [vmem:[%s1416_s19 + $0x30] sm:$0xff]  ;;  %v261_v15 = vpack.c.bf16 %v253_v11, %v253_v11  ;;  %v262_v16 = vpack.c.bf16 %v254_v12, %v254_v12  ;;  %v1436_v17 = vld [vmem:[%s1416_s19 + $0x38] sm:$0xff]  ;;  %s953_s15 = sshll.u32 %s949_s11, 4  ;;  %s1242_s30 = scalar_lea.hbm %s1811_s5, 16  ;;  %s954_s15 = int_to_ptr.hbm [resolvable:$true] %s953_s15 }
  0x30   : > { %v281_v14 = vunpack.c.l.b16 %v257_v5  ;;  %v263_v18 = vpack.c.bf16 %v255_v13, %v255_v13  ;;  %v282_v19 = vunpack.c.l.b16 %v258_v8  ;;  %v283_v20 = vunpack.c.l.b16 %v259_v9  ;;  %v1118_v31 = vld [vmem:[%s1808_s2] ss:$0 sm:$0xff]  ;;  %s1236_s14 = sshra.s32 %s954_s15, 4  ;;  %s1237_s14 = int_to_ptr.hbm [resolvable:$true] %s1236_s14 }
  0x31   : > { %v284_v21 = vunpack.c.l.b16 %v260_v10  ;;  %v264_v22 = vpack.c.bf16 %v1436_v17, %v1436_v17  ;;  %v285_v23 = vunpack.c.l.b16 %v261_v15  ;;  %v286_v24 = vunpack.c.l.b16 %v262_v16  ;;  %325 = vmatpush.bf16.msra.mxu0 %v1058_v2  ;;  %1063 = vmatpush.bf16.msra.mxu1 %v1058_v2  ;;  %s1238_s16 = scalar_lea.hbm %s1237_s14, 8  ;;  %p1243_p0 = scmp.lt.s32.totalorder %s1237_s14, %s1811_s5 }
  0x32   : > { %v287_v25 = vunpack.c.l.b16 %v263_v18  ;;  %v289_v26 = vpack.c.b16 %v282_v19, %v281_v14  ;;  %1064 = vmatpush.bf16.msra.mxu2 %v1058_v2  ;;  %1065 = vmatpush.bf16.msra.mxu3 %v1058_v2  ;;  %p1239_p6 = scmp.ne.s32.totalorder %s1237_s14, %s1238_s16  ;;  %p1244_p1 = scmp.lt.s32.totalorder %s1242_s30, %s1238_s16 }
  0x33   : > { %v290_v27 = vpack.c.b16 %v284_v21, %v283_v20  ;;  %v288_v28 = vunpack.c.l.b16 %v264_v22  ;;  %v291_v29 = vpack.c.b16 %v286_v24, %v285_v23 }
  0x34   : > { %1041 = vmatmul.msk.bf16.vlgmr.msra.gmra.mxu0 %vm305_vm0, %v289_v26  ;;  %p1240_p9 = pnand %p1239_p6, %p1376_p11  ;;  %p1245_p3 = por %p1244_p1, %p1243_p0 }
  0x35   : > { %v292_v30 = vpack.c.b16 %v288_v28, %v287_v25  ;;  %1042 = vmatmul.msk.bf16.vlgmr.msra.gmra.mxu1 %vm305_vm0, %v290_v27  ;;  %1043 = vmatmul.msk.bf16.vlgmr.msra.gmra.mxu2 %vm305_vm0, %v291_v29  ;;  %v1481_v25 = vld [vmem:[%s1809_s3] ss:$0 sm:$0xff] }
  0x36   : > { %p1241_p13 = pneg %p1240_p9 }
  0x37   : > { %1044 = vmatmul.msk.bf16.vlgmr.msra.gmra.mxu3 %vm305_vm0, %v292_v30 }
  0x38   : > { %p1246_p4 = pnand %p1245_p3, %p1241_p13 }
  0xb1   : > { %v327_v32 = vpop.f32.mrf.mxu0 }
  0xb2   : > { %v332_v33 = vpop.f32.mrf.mxu1  ;;  %v328_v34 = vadd.f32 %v1118_v31, %v327_v32 }
  0xb3   : > { %v333_v35 = vadd.f32 %v1118_v31, %v332_v33 }
  0xb4   : > { %v1045_v36 = vmul.f32 -1.442695, %v328_v34 }
  0xb5   : > { %v1047_v37 = vmul.f32 -1.442695, %v333_v35 }
  0xb6   : > { %1121 = vpow2.f32 %v1045_v36 }
  0xb7   : > { %1123 = vpow2.f32 %v1047_v37 }
  0xb8   : > { %v337_v38 = vpop.f32.mrf.mxu2 }
  0xb9   : > { %v338_v40 = vadd.f32 %v1118_v31, %v337_v38  ;;  %v329_v42 = vpop.f32.mrf.mxu0 }
  0xba   : > { %v342_v39 = vpop.f32.mrf.mxu3  ;;  %v334_v43 = vpop.f32.mrf.mxu1  ;;  %v330_v44 = vadd.f32 %v1118_v31, %v329_v42 }
  0xbb   : > { %v343_v41 = vadd.f32 %v1118_v31, %v342_v39  ;;  %v335_v45 = vadd.f32 %v1118_v31, %v334_v43  ;;  %v1049_v46 = vmul.f32 -1.442695, %v338_v40 }
  0xbc   : > { %v1122_v48 = vpop.eup %1121  ;;  %v1046_v51 = vmul.f32 -1.442695, %v330_v44 }
  0xbd   : > { %v1051_v47 = vmul.f32 -1.442695, %v343_v41  ;;  %v1124_v49 = vpop.eup %1123  ;;  %v371_v50 = vadd.f32 1.0, %v1122_v48  ;;  %1125 = vpow2.f32 %v1049_v46  ;;  %v1048_v53 = vmul.f32 -1.442695, %v335_v45 }
  0xbe   : > { %v1447_v52 = vadd.f32 1.0, %v1124_v49 }
  0xbf   : > { %1127 = vpow2.f32 %v1051_v47  ;;  %v388_v60 = vand.u32 2147483647, %v371_v50  ;;  %vm384_vm1 = vweird.f32 %v371_v50  ;;  %v390_v5 = vand.u32 2147483648, %v371_v50 }
  0xc0   : > { %1129 = vrcp.f32 %v371_v50  ;;  %v339_v54 = vpop.f32.mrf.mxu2  ;;  %v418_v0 = vand.u32 2147483647, %v1447_v52  ;;  %vm414_vm2 = vweird.f32 %v1447_v52  ;;  %v420_v8 = vand.u32 2147483648, %v1447_v52 }
  0xc1   : > { %1131 = vrcp.f32 %v1447_v52  ;;  %v340_v56 = vadd.f32 %v1118_v31, %v339_v54  ;;  %vm1459_vm4 = vcmp.eq.f32.partialorder %v388_v60, 8.507059e+37  ;;  %v391_v27 = vor.u32 1.1754944e-38, %v390_v5 }
  0xc2   : > { %v344_v55 = vpop.f32.mrf.mxu3  ;;  %1133 = vpow2.f32 %v1046_v51  ;;  %vm1465_vm5 = vcmp.eq.f32.partialorder %v418_v0, 8.507059e+37  ;;  %v421_v22 = vor.u32 1.1754944e-38, %v420_v8 }
  0xc3   : > { %v345_v57 = vadd.f32 %v1118_v31, %v344_v55  ;;  %1135 = vpow2.f32 %v1048_v53  ;;  %v1126_v58 = vpop.eup %1125  ;;  %v1050_v59 = vmul.f32 -1.442695, %v340_v56 }
  0xc4   : > { %v1450_v62 = vadd.f32 1.0, %v1126_v58 }
  0xc5   : > { %v1128_v61 = vpop.eup %1127  ;;  %v1052_v63 = vmul.f32 -1.442695, %v345_v57  ;;  %1137 = vpow2.f32 %v1050_v59 }
  0xc6   : > { %v1130_v1 = vpop.eup %1129  ;;  %v1453_v2 = vadd.f32 1.0, %v1128_v61  ;;  %1139 = vrcp.f32 %v1450_v62  ;;  %v448_v16 = vand.u32 2147483647, %v1450_v62  ;;  %v450_v19 = vand.u32 2147483648, %v1450_v62 }
  0xc7   : > { %v1132_v3 = vpop.eup %1131  ;;  %v380_v4 = vmul.f32 %v1130_v1, %v371_v50  ;;  %1141 = vpow2.f32 %v1052_v63  ;;  %vm385_vm6 = vweird.f32 %v1130_v1  ;;  %vm444_vm8 = vweird.f32 %v1450_v62 }
  0xc8   : > { %v1134_v6 = vpop.eup %1133  ;;  %v410_v7 = vmul.f32 %v1132_v3, %v1447_v52  ;;  %1143 = vrcp.f32 %v1453_v2  ;;  %vm415_vm7 = vweird.f32 %v1132_v3  ;;  %vm386_vm9 = vmor %vm384_vm1, %vm385_vm6  ;;  %vm1486_vm10 = vcmp.eq.f32.partialorder %v448_v16, 8.507059e+37 }
  0xc9   : > { %v1136_v10 = vpop.eup %1135  ;;  %v1463_v11 = vadd.f32 1.0, %v1134_v6  ;;  %v381_v13 = vsub.f32 1.0, %v380_v4  ;;  %vm416_vm11 = vmor %vm414_vm2, %vm415_vm7  ;;  %v451_v35 = vor.u32 1.1754944e-38, %v450_v19  ;;  %vm474_vm1 = vweird.f32 %v1453_v2 }
  0xca   : > { %v1470_v14 = vadd.f32 1.0, %v1136_v10  ;;  %v411_v15 = vsub.f32 1.0, %v410_v7 }
  0xcb   : > { %1145 = vrcp.f32 %v1463_v11  ;;  %v382_v18 = vmul.f32 %v1130_v1, %v381_v13  ;;  %v1138_v20 = vpop.eup %1137  ;;  %v403_v31 = vand.u32 2147483647, %v1463_v11  ;;  %v405_v32 = vand.u32 2147483648, %v1463_v11 }
  0xcc   : > { %1147 = vrcp.f32 %v1470_v14  ;;  %v412_v21 = vmul.f32 %v1132_v3, %v411_v15  ;;  %v1140_v23 = vpop.eup %1139  ;;  %v1476_v24 = vadd.f32 1.0, %v1138_v20  ;;  %v433_v36 = vand.u32 2147483647, %v1470_v14 }
  0xcd   : > { %v383_v26 = vadd.f32 %v1130_v1, %v382_v18  ;;  %v440_v29 = vmul.f32 %v1140_v23, %v1450_v62  ;;  %v1142_v33 = vpop.eup %1141  ;;  %vm399_vm12 = vweird.f32 %v1463_v11  ;;  %vm445_vm13 = vweird.f32 %v1140_v23 }
  0xce   : > { %v413_v28 = vadd.f32 %v1132_v3, %v412_v21  ;;  %1149 = vrcp.f32 %v1476_v24  ;;  %v1497_v37 = vpop.eup %1143  ;;  %v1499_v38 = vadd.f32 1.0, %v1142_v33  ;;  %vm429_vm14 = vweird.f32 %v1470_v14 }
  0xcf   : > { %v387_v34 = vsel %vm386_vm9, %v1130_v1, %v383_v26  ;;  %v441_v41 = vsub.f32 1.0, %v440_v29  ;;  %vm1510_vm15 = vcmp.eq.f32.partialorder %v403_v31, 8.507059e+37  ;;  %v406_v50 = vor.u32 1.1754944e-38, %v405_v32 }
  0xd0   : > { %v417_v39 = vsel %vm416_vm11, %v1132_v3, %v413_v28  ;;  %v392_v40 = vsel %vm1459_vm4, %v391_v27, %v387_v34  ;;  %vm1517_vm2 = vcmp.eq.f32.partialorder %v433_v36, 8.507059e+37  ;;  %v435_v54 = vand.u32 2147483648, %v1470_v14  ;;  %vm446_vm4 = vmor %vm444_vm8, %vm445_vm13 }
  0xd1   : > { %v1146_v42 = vpop.eup %1145  ;;  %v422_v43 = vsel %vm1465_vm5, %v421_v22, %v417_v39  ;;  %v503_v44 = vmul.f32 %v1481_v25, %v392_v40  ;;  %v442_v47 = vmul.f32 %v1140_v23, %v441_v41  ;;  %1151 = vrcp.f32 %v1499_v38 }
  0xd2   : > { %v1148_v45 = vpop.eup %1147  ;;  %v505_v46 = vmul.f32 %v1481_v25, %v422_v43  ;;  %v395_v48 = vmul.f32 %v1146_v42, %v1463_v11  ;;  %vm400_vm5 = vweird.f32 %v1146_v42  ;;  %vm459_vm6 = vweird.f32 %v1476_v24 }
  0xd3   : > { %v512_v51 = vsel %vm511_vm3, %v503_v44, 0.0  ;;  %v425_v52 = vmul.f32 %v1148_v45, %v1470_v14  ;;  %v443_v56 = vadd.f32 %v1140_v23, %v442_v47  ;;  %v470_v60 = vmul.f32 %v1497_v37, %v1453_v2  ;;  %vm401_vm8 = vmor %vm399_vm12, %vm400_vm5 }
  0xd4   : > { %v518_v55 = vsel %vm511_vm3, %v505_v46, 0.0  ;;  %513 = vadd.xlane.f32.xlu0 %v512_v51  ;;  %v396_v57 = vsub.f32 1.0, %v395_v48  ;;  %v1150_v58 = vpop.eup %1149  ;;  %vm430_vm7 = vweird.f32 %v1148_v45  ;;  %v436_v4 = vor.u32 1.1754944e-38, %v435_v54  ;;  %v1120_v51 = vld [vmem:[#allocation2] ss:$0 sm:$0xff] }
  0xd5   : > { %519 = vadd.xlane.f32.xlu1 %v518_v55  ;;  %v426_v59 = vsub.f32 1.0, %v425_v52  ;;  %v447_v61 = vsel %vm446_vm4, %v1140_v23, %v443_v56  ;;  %v455_v0 = vmul.f32 %v1150_v58, %v1476_v24  ;;  %v463_v62 = vand.u32 2147483647, %v1476_v24 }
  0xd6   : > { %v397_v63 = vmul.f32 %v1146_v42, %v396_v57  ;;  %v452_v1 = vsel %vm1486_vm10, %v451_v35, %v447_v61  ;;  %v471_v8 = vsub.f32 1.0, %v470_v60  ;;  %vm460_vm9 = vweird.f32 %v1150_v58  ;;  %vm431_vm10 = vmor %vm429_vm14, %vm430_vm7 }
  0xd7   : > { %v427_v3 = vmul.f32 %v1148_v45, %v426_v59  ;;  %v507_v5 = vmul.f32 %v1481_v25, %v452_v1  ;;  %v456_v7 = vsub.f32 1.0, %v455_v0  ;;  %v465_v10 = vand.u32 2147483648, %v1476_v24  ;;  %v1152_v12 = vpop.eup %1151  ;;  %vm461_vm12 = vmor %vm459_vm6, %vm460_vm9 }
  0xd8   : > { %v398_v6 = vadd.f32 %v1146_v42, %v397_v63  ;;  %vm475_vm11 = vweird.f32 %v1497_v37  ;;  %v472_v18 = vmul.f32 %v1497_v37, %v471_v8  ;;  %v478_v20 = vand.u32 2147483647, %v1453_v2 }
  0xd9   : > { %v428_v9 = vadd.f32 %v1148_v45, %v427_v3  ;;  %v524_v13 = vsel %vm511_vm3, %v507_v5, 0.0  ;;  %v457_v16 = vmul.f32 %v1150_v58, %v456_v7  ;;  %v480_v21 = vand.u32 2147483648, %v1453_v2  ;;  %vm1560_vm13 = vmor %vm474_vm1, %vm475_vm11 }
  0xda   : > { %v402_v15 = vsel %vm401_vm8, %v1146_v42, %v398_v6  ;;  %525 = vadd.xlane.f32.xlu2 %v524_v13  ;;  %v473_v14 = vadd.f32 %v1497_v37, %v472_v18  ;;  %v466_v27 = vor.u32 1.1754944e-38, %v465_v10  ;;  %v485_v29 = vmul.f32 %v1152_v12, %v1499_v38 }
  0xdb   : > { %v407_v11 = vsel %vm1510_vm15, %v406_v50, %v402_v15  ;;  %v432_v19 = vsel %vm431_vm10, %v1148_v45, %v428_v9  ;;  %v458_v26 = vadd.f32 %v1150_v58, %v457_v16  ;;  %vm464_vm14 = vcmp.eq.f32.partialorder %v463_v62, 8.507059e+37 }
  0xdc   : > { %v504_v22 = vmul.f32 %v1481_v25, %v407_v11  ;;  %v437_v23 = vsel %vm1517_vm2, %v436_v4, %v432_v19  ;;  %v1292_v24 = vmov 0   ;;  %v481_v34 = vor.u32 1.1754944e-38, %v480_v21 }
  0xdd   : > { %v506_v31 = vmul.f32 %v1481_v25, %v437_v23  ;;  %v462_v32 = vsel %vm461_vm12, %v1150_v58, %v458_v26  ;;  %1115 = vset.pattern.permute.xlu1 %v1292_v24  ;;  %1117 = vset.pattern.permute.xlu2 %v1292_v24  ;;  %v486_v35 = vsub.f32 1.0, %v485_v29  ;;  %v477_v2 = vsel %vm1560_vm13, %v1497_v37, %v473_v14 }
  0xde   : > { %v515_v30 = vsel %vm511_vm3, %v504_v22, 0.0  ;;  %v467_v33 = vsel %vm464_vm14, %v466_v27, %v462_v32  ;;  %vm479_vm15 = vcmp.eq.f32.partialorder %v478_v20, 8.507059e+37  ;;  %1116 = vset.pattern.permute.xlu0 %v1292_v24  ;;  %vm489_vm1 = vweird.f32 %v1499_v38 }
  0xdf   : > { %516 = vadd.xlane.f32.xlu0 %v515_v30  ;;  %v487_v36 = vmul.f32 %v1152_v12, %v486_v35  ;;  %vm490_vm2 = vweird.f32 %v1152_v12  ;;  %v495_v39 = vand.u32 2147483648, %v1499_v38  ;;  %v521_v40 = vsel %vm511_vm3, %v506_v31, 0.0 }
  0xe0   : > { %v508_v41 = vmul.f32 %v1481_v25, %v467_v33  ;;  %v493_v42 = vand.u32 2147483647, %v1499_v38  ;;  %v482_v43 = vsel %vm479_vm15, %v481_v34, %v477_v2  ;;  %vm491_vm4 = vmor %vm489_vm1, %vm490_vm2  ;;  %v559_v58 = vlaneseq }
  0xe1   : > { %v488_v44 = vadd.f32 %v1152_v12, %v487_v36  ;;  %v496_v37 = vor.u32 1.1754944e-38, %v495_v39  ;;  %v509_v47 = vmul.f32 %v1481_v25, %v482_v43  ;;  %vm569_vm6 = vcmask 1041409  }
  0xe2   : > { %522 = vadd.xlane.f32.xlu2 %v521_v40  ;;  %v527_v46 = vsel %vm511_vm3, %v508_v41, 0.0  ;;  %vm494_vm5 = vcmp.eq.f32.partialorder %v493_v42, 8.507059e+37  ;;  %v1580_v59 = vand.u32 127, %v559_v58  ;;  %vm573_vm7 = vcmask 1043459  }
  0xe3   : > { %v492_v45 = vsel %vm491_vm4, %v1152_v12, %v488_v44  ;;  %v530_v49 = vsel %vm511_vm3, %v509_v47, 0.0  ;;  %vm575_vm8 = vcmask 1044484   ;;  %vm577_vm9 = vcmask 1045509  }
  0xe4   : > { %v497_v48 = vsel %vm494_vm5, %v496_v37, %v492_v45  ;;  %vm1813_vm11 = vcmask 1046534   ;;  %vm1812_vm10 = vcmask 1047559   ;;  %vm584_vm12 = vcmask 64512  }
  0xe5   : > { %v510_v50 = vmul.f32 %v1481_v25, %v497_v48 }
  0xe7   : > { %528 = vadd.xlane.f32.xlu0 %v527_v46  ;;  %v533_v38 = vsel %vm511_vm3, %v510_v50, 0.0  ;;  %vm571_vm3 = vcmask 1042434  }
  0xea   : > { %531 = vadd.xlane.f32.xlu2 %v530_v49 }
  0xee   : > { %540 = vperm.xlu1 %1115, %v1120_v51  }
  0xef   : > { %534 = vadd.xlane.f32.xlu0 %v533_v38 }
 0x147   : > { %v514_v52 = vpop.xlane.xlu0 %513 }
 0x148   : > { %v520_v55 = vpop.xlane.xlu1 %519 }
 0x14d   : > { %v526_v53 = vpop.xlane.xlu2 %525 }
 0x152   : > { %v517_v54 = vpop.xlane.xlu0 %516 }
 0x155   : > { %v523_v56 = vpop.xlane.xlu2 %522 }
 0x15a   : > { %v529_v57 = vpop.xlane.xlu0 %528 }
 0x15d   : > { %v532_v4 = vpop.xlane.xlu2 %531 }
 0x160   : > { %v541_v60 = vpop.permute.xlu1 %540 }
 0x161   : > { %v543_v61 = vadd.f32 %v541_v60, %v514_v52  ;;  %v544_v63 = vadd.f32 %v541_v60, %v517_v54  ;;  %v545_v0 = vadd.f32 %v541_v60, %v520_v55  ;;  %v546_v25 = vadd.f32 %v541_v60, %v523_v56 }
 0x162   : > { %v535_v1 = vpop.xlane.xlu0 %534  ;;  %v547_v3 = vadd.f32 %v541_v60, %v526_v53  ;;  %v548_v62 = vadd.f32 %v541_v60, %v529_v57  ;;  %v549_v8 = vadd.f32 %v541_v60, %v532_v4 }
 0x163   : > { %v561_v5 = vperm.slane %v543_v61, %v1580_v59  ;;  %v562_v6 = vperm.slane %v544_v63, %v1580_v59  ;;  %v563_v7 = vperm.slane %v545_v0, %v1580_v59  ;;  %v550_v9 = vadd.f32 %v541_v60, %v535_v1 }
 0x164   : > { %v564_v10 = vperm.slane %v546_v25, %v1580_v59  ;;  %v565_v13 = vperm.slane %v547_v3, %v1580_v59  ;;  %v566_v16 = vperm.slane %v548_v62, %v1580_v59  ;;  %v567_v11 = vperm.slane %v549_v8, %v1580_v59 }
 0x165   : > { %v570_v12 = vsel %vm569_vm6, %v562_v6, %v561_v5  ;;  %v568_v20 = vperm.slane %v550_v9, %v1580_v59 }
 0x166   : > { %v572_v15 = vsel %vm571_vm3, %v563_v7, %v570_v12 }
 0x167   : > { %v574_v18 = vsel %vm573_vm7, %v564_v10, %v572_v15 }
 0x168   : > { %v576_v19 = vsel %vm575_vm8, %v565_v13, %v574_v18 }
 0x169   : > { %v578_v21 = vsel %vm577_vm9, %v566_v16, %v576_v19 }
 0x16a   : > { %v580_v22 = vsel %vm1813_vm11, %v567_v11, %v578_v21 }
 0x16b   : > { %v582_v23 = vsel %vm1812_vm10, %v568_v20, %v580_v22 }
 0x16c   : > { %v585_v26 = vsel %vm584_vm12, %v582_v23, -inf }
 0x16d   : > { %586 = vmax.xlane.f32.xlu2 %v585_v26 }
 0x1e0   : > { %v587_v14 = vpop.xlane.xlu2 %586 }
 0x1e1   : > { %v591_v27 = vperm.slane %v587_v14, 2  ;;  %v590_v28 = vperm.slane %v587_v14, 1  ;;  %v589_v29 = vperm.slane %v587_v14, 0  ;;  %v592_v24 = vperm.slane %v587_v14, 3 }
 0x1e2   : > { %v594_v33 = vperm.slane %v587_v14, 5  ;;  %v593_v41 = vperm.slane %v587_v14, 4  ;;  %v596_v43 = vperm.slane %v587_v14, 7  ;;  %v595_v49 = vperm.slane %v587_v14, 6 }
 0x1e3   : > { %v607_v30 = vsub.f32 %v545_v0, %v591_v27  ;;  %v606_v31 = vsub.f32 %v544_v63, %v590_v28  ;;  %v605_v32 = vsub.f32 %v543_v61, %v589_v29  ;;  %v608_v36 = vsub.f32 %v546_v25, %v592_v24 }
 0x1e4   : > { %v610_v39 = vsub.f32 %v548_v62, %v594_v33  ;;  %v609_v46 = vsub.f32 %v547_v3, %v593_v41  ;;  %v612_v47 = vsub.f32 %v550_v9, %v596_v43  ;;  %v611_v52 = vsub.f32 %v549_v8, %v595_v49 }
 0x1e5   : > { %v617_v34 = vmul.f32 1.442695, %v607_v30  ;;  %v615_v35 = vmul.f32 1.442695, %v606_v31  ;;  %v613_v2 = vmul.f32 1.442695, %v605_v32 }
 0x1e6   : > { %v619_v40 = vmul.f32 1.442695, %v608_v36  ;;  %v623_v42 = vmul.f32 1.442695, %v610_v39  ;;  %v621_v48 = vmul.f32 1.442695, %v609_v46 }
 0x1e7   : > { %1153 = vpow2.f32 %v617_v34  ;;  %v627_v50 = vmul.f32 1.442695, %v612_v47  ;;  %v625_v53 = vmul.f32 1.442695, %v611_v52 }
 0x1e8   : > { %1155 = vpow2.f32 %v615_v35 }
 0x1e9   : > { %1157 = vpow2.f32 %v613_v2 }
 0x1ea   : > { %1159 = vpow2.f32 %v619_v40 }
 0x1eb   : > { %1161 = vpow2.f32 %v623_v42 }
 0x1ec   : > { %1163 = vpow2.f32 %v621_v48 }
 0x1ed   : > { %v1598_v44 = vpop.eup %1153  ;;  %1165 = vpow2.f32 %v627_v50 }
 0x1ee   : > { %v1600_v45 = vpop.eup %1155  ;;  %644 = vperm.xlu1 %1115, %v1598_v44   ;;  %1167 = vpow2.f32 %v625_v53 }
 0x1ef   : > { %v1603_v37 = vpop.eup %1157  ;;  %641 = vperm.xlu2 %1117, %v1600_v45  }
 0x1f0   : > { %638 = vperm.xlu0 %1116, %v1603_v37   ;;  %v1607_v51 = vpop.eup %1159 }
 0x1f1   : > { %v1609_v38 = vpop.eup %1161 }
 0x1f2   : > { %v1613_v54 = vpop.eup %1163 }
 0x1f3   : > { %v1615_v55 = vpop.eup %1165 }
 0x1f4   : > { %v1619_v56 = vpop.eup %1167 }
 0x1f6   : > { %647 = vperm.xlu1 %1115, %v1607_v51  }
 0x1f7   : > { %653 = vperm.xlu2 %1117, %v1609_v38  }
 0x1fe   : > { %650 = vperm.xlu1 %1115, %v1613_v54  }
 0x1ff   : > { %659 = vperm.xlu2 %1117, %v1615_v55  }
 0x206   : > { %656 = vperm.xlu1 %1115, %v1619_v56  }
 0x249   : > { %v642_v58 = vpop.permute.xlu2 %641 }
 0x24a   : > { %v662_v25 = vperm.slane %v642_v58, %v1580_v59 }
 0x251   : > { %v654_v63 = vpop.permute.xlu2 %653 }
 0x252   : > { %v666_v10 = vperm.slane %v654_v63, %v1580_v59 }
 0x259   : > { %v660_v8 = vpop.permute.xlu2 %659 }
 0x25a   : > { %v668_v15 = vperm.slane %v660_v8, %v1580_v59 }
 0x260   : > { %v645_v57 = vpop.permute.xlu1 %644 }
 0x261   : > { %v663_v3 = vperm.slane %v645_v57, %v1580_v59 }
 0x262   : > { %v639_v61 = vpop.permute.xlu0 %638 }
 0x263   : > { %v661_v0 = vperm.slane %v639_v61, %v1580_v59 }
 0x265   : > { %v669_v4 = vsel %vm569_vm6, %v662_v25, %v661_v0 }
 0x266   : > { %v670_v6 = vsel %vm571_vm3, %v663_v3, %v669_v4 }
 0x268   : > { %v648_v60 = vpop.permute.xlu1 %647 }
 0x269   : > { %v664_v62 = vperm.slane %v648_v60, %v1580_v59 }
 0x26b   : > { %v671_v7 = vsel %vm573_vm7, %v664_v62, %v670_v6 }
 0x270   : > { %v651_v1 = vpop.permute.xlu1 %650 }
 0x271   : > { %v665_v5 = vperm.slane %v651_v1, %v1580_v59 }
 0x273   : > { %v672_v9 = vsel %vm575_vm8, %v665_v5, %v671_v7 }
 0x274   : > { %v673_v16 = vsel %vm577_vm9, %v666_v10, %v672_v9 }
 0x278   : > { %v657_v12 = vpop.permute.xlu1 %656 }
 0x279   : > { %v667_v13 = vperm.slane %v657_v12, %v1580_v59 }
 0x27b   : > { %v674_v18 = vsel %vm1813_vm11, %v667_v13, %v673_v16 }
 0x27c   : > { %v675_v11 = vsel %vm1812_vm10, %v668_v15, %v674_v18 }
 0x27d   : > { %v677_v19 = vsel %vm584_vm12, %v675_v11, 0.0 }
 0x27e   : > { %678 = vadd.xlane.f32.xlu1 %v677_v19 }
 0x2f1   : > { %v679_v20 = vpop.xlane.xlu1 %678 }
 0x2f2   : > { %v681_v21 = vperm.slane %v679_v20, 0  ;;  %v682_v22 = vperm.slane %v679_v20, 1  ;;  %v1638_v23 = vperm.slane %v679_v20, 2  ;;  %v1640_v26 = vperm.slane %v679_v20, 3 }
 0x2f3   : > { %v1642_v14 = vperm.slane %v679_v20, 4  ;;  %v1644_v59 = vperm.slane %v679_v20, 5  ;;  %v1650_v31 = vperm.slane %v679_v20, 7  ;;  %v1652_v33 = vperm.slane %v679_v20, 6 }
 0x2f4   : > { %1169 = vrcp.f32 %v681_v21  ;;  %v721_v27 = vand.u32 2147483647, %v682_v22  ;;  %v723_v28 = vand.u32 2147483648, %v682_v22  ;;  %v706_v29 = vand.u32 2147483647, %v681_v21 }
 0x2f5   : > { %1171 = vrcp.f32 %v682_v22  ;;  %v708_v32 = vand.u32 2147483648, %v681_v21  ;;  %vm717_vm13 = vweird.f32 %v682_v22  ;;  %vm702_vm15 = vweird.f32 %v681_v21 }
 0x2f6   : > { %1173 = vrcp.f32 %v1638_v23  ;;  %vm1656_vm14 = vcmp.eq.f32.partialorder %v721_v27, 8.507059e+37  ;;  %v724_v40 = vor.u32 1.1754944e-38, %v723_v28  ;;  %vm1662_vm1 = vcmp.eq.f32.partialorder %v706_v29, 8.507059e+37 }
 0x2f7   : > { %1175 = vrcp.f32 %v1640_v26  ;;  %v709_v48 = vor.u32 1.1754944e-38, %v708_v32  ;;  %v753_v0 = vand.u32 2147483648, %v1640_v26  ;;  %v738_v1 = vand.u32 2147483648, %v1638_v23 }
 0x2f8   : > { %1177 = vrcp.f32 %v1642_v14  ;;  %v736_v16 = vand.u32 2147483647, %v1638_v23  ;;  %v751_v11 = vand.u32 2147483647, %v1640_v26  ;;  %v783_v28 = vand.u32 2147483648, %v1644_v59 }
 0x2f9   : > { %1179 = vrcp.f32 %v1644_v59  ;;  %v766_v36 = vand.u32 2147483647, %v1642_v14 }
 0x2fa   : > { %v1170_v30 = vpop.eup %1169  ;;  %1181 = vrcp.f32 %v1650_v31 }
 0x2fb   : > { %v1172_v24 = vpop.eup %1171  ;;  %v698_v34 = vmul.f32 %v1170_v30, %v681_v21  ;;  %vm703_vm2 = vweird.f32 %v1170_v30  ;;  %1183 = vrcp.f32 %v1652_v33  ;;  %v739_v21 = vor.u32 1.1754944e-38, %v738_v1 }
 0x2fc   : > { %v1654_v35 = vpop.eup %1173  ;;  %v713_v2 = vmul.f32 %v1172_v24, %v682_v22  ;;  %vm718_vm4 = vweird.f32 %v1172_v24  ;;  %vm704_vm5 = vmor %vm702_vm15, %vm703_vm2  ;;  %vm747_vm15 = vweird.f32 %v1640_v26  ;;  %vm752_vm2 = vcmp.eq.f32.partialorder %v751_v11, 8.507059e+37 }
 0x2fd   : > { %v1660_v39 = vpop.eup %1175  ;;  %v699_v41 = vsub.f32 1.0, %v698_v34  ;;  %v728_v43 = vmul.f32 %v1654_v35, %v1638_v23  ;;  %vm733_vm12 = vweird.f32 %v1654_v35  ;;  %vm719_vm10 = vmor %vm717_vm13, %vm718_vm4  ;;  %vm732_vm13 = vweird.f32 %v1638_v23 }
 0x2fe   : > { %v1668_v46 = vpop.eup %1177  ;;  %v714_v47 = vsub.f32 1.0, %v713_v2  ;;  %v743_v49 = vmul.f32 %v1660_v39, %v1640_v26  ;;  %vm748_vm11 = vweird.f32 %v1660_v39  ;;  %v754_v26 = vor.u32 1.1754944e-38, %v753_v0 }
 0x2ff   : > { %v1673_v50 = vpop.eup %1179  ;;  %v700_v52 = vmul.f32 %v1170_v30, %v699_v41  ;;  %v729_v53 = vsub.f32 1.0, %v728_v43  ;;  %v758_v57 = vmul.f32 %v1668_v46, %v1642_v14  ;;  %v768_v34 = vand.u32 2147483648, %v1642_v14 }
 0x300   : > { %v715_v58 = vmul.f32 %v1172_v24, %v714_v47  ;;  %v744_v60 = vsub.f32 1.0, %v743_v49  ;;  %v773_v61 = vmul.f32 %v1673_v50, %v1644_v59  ;;  %v1689_v7 = vpop.eup %1181  ;;  %vm778_vm4 = vweird.f32 %v1673_v50 }
 0x301   : > { %v701_v63 = vadd.f32 %v1170_v30, %v700_v52  ;;  %v730_v25 = vmul.f32 %v1654_v35, %v729_v53  ;;  %v759_v6 = vsub.f32 1.0, %v758_v57  ;;  %v1708_v20 = vpop.eup %1183  ;;  %v803_v23 = vmul.f32 %v1689_v7, %v1650_v31 }
 0x302   : > { %v716_v3 = vadd.f32 %v1172_v24, %v715_v58  ;;  %v745_v4 = vmul.f32 %v1660_v39, %v744_v60  ;;  %v774_v12 = vsub.f32 1.0, %v773_v61  ;;  %v788_v32 = vmul.f32 %v1708_v20, %v1652_v33 }
 0x303   : > { %v705_v62 = vsel %vm704_vm5, %v1170_v30, %v701_v63  ;;  %v731_v5 = vadd.f32 %v1654_v35, %v730_v25  ;;  %vm762_vm5 = vweird.f32 %v1642_v14  ;;  %v781_v41 = vand.u32 2147483647, %v1644_v59 }
 0x304   : > { %v720_v8 = vsel %vm719_vm10, %v1172_v24, %v716_v3  ;;  %v710_v9 = vsel %vm1662_vm1, %v709_v48, %v705_v62  ;;  %v746_v10 = vadd.f32 %v1660_v39, %v745_v4  ;;  %vm734_vm10 = vmor %vm732_vm13, %vm733_vm12  ;;  %v775_v22 = vmul.f32 %v1673_v50, %v774_v12  ;;  %v1187_v12 = vld [vmem:[%s1416_s19 + $0x18] sm:$0xff] }
 0x305   : > { %v725_v13 = vsel %vm1656_vm14, %v724_v40, %v720_v8  ;;  %v711_v15 = vmul.f32 %v1603_v37, %v710_v9  ;;  %vm749_vm1 = vmor %vm747_vm15, %vm748_vm11  ;;  %v735_v19 = vsel %vm734_vm10, %v1654_v35, %v731_v5  ;;  %v760_v37 = vmul.f32 %v1668_v46, %v759_v6  ;;  %v1185_v5 = vld [vmem:[%s1416_s19] sm:$0xff] }
 0x306   : > { %v726_v18 = vmul.f32 %v1600_v45, %v725_v13  ;;  %v750_v45 = vsel %vm749_vm1, %v1660_v39, %v746_v10  ;;  %vm737_vm14 = vcmp.eq.f32.partialorder %v736_v16, 8.507059e+37  ;;  %vm763_vm11 = vweird.f32 %v1668_v46 }
 0x307   : > { %819 = vperm.xlu0 %1116, %v711_v15   ;;  %v740_v27 = vsel %vm737_vm14, %v739_v21, %v735_v19  ;;  %v755_v29 = vsel %vm752_vm2, %v754_v26, %v750_v45  ;;  %v761_v30 = vadd.f32 %v1668_v46, %v760_v37  ;;  %v776_v24 = vadd.f32 %v1673_v50, %v775_v22  ;;  %vm764_vm13 = vmor %vm762_vm5, %vm763_vm11  ;;  %v1189_v37 = vld [vmem:[%s1416_s19 + $0x28] sm:$0xff] }
 0x308   : > { %824 = vperm.xlu2 %1117, %v726_v18   ;;  %v804_v35 = vsub.f32 1.0, %v803_v23  ;;  %v741_v2 = vmul.f32 %v1598_v44, %v740_v27  ;;  %v789_v39 = vsub.f32 1.0, %v788_v32  ;;  %v756_v40 = vmul.f32 %v1607_v51, %v755_v29  ;;  %v1188_v18 = vld [vmem:[%s1416_s19 + $0x10] sm:$0xff] }
 0x309   : > { %vm777_vm12 = vweird.f32 %v1644_v59  ;;  %v765_v42 = vsel %vm764_vm13, %v1668_v46, %v761_v30  ;;  %v769_v47 = vor.u32 1.1754944e-38, %v768_v34  ;;  %v784_v48 = vor.u32 1.1754944e-38, %v783_v28 }
 0x30a   : > { %vm779_vm15 = vmor %vm777_vm12, %vm778_vm4  ;;  %v790_v43 = vmul.f32 %v1708_v20, %v789_v39  ;;  %v805_v14 = vmul.f32 %v1689_v7, %v804_v35  ;;  %vm767_vm10 = vcmp.eq.f32.partialorder %v766_v36, 8.507059e+37  ;;  %vm782_vm1 = vcmp.eq.f32.partialorder %v781_v41, 8.507059e+37  ;;  %v1190_v39 = vld [vmem:[%s1416_s19 + $0x20] sm:$0xff] }
 0x30b   : > { %v780_v44 = vsel %vm779_vm15, %v1673_v50, %v776_v24  ;;  %v770_v51 = vsel %vm767_vm10, %v769_v47, %v765_v42  ;;  %vm793_vm14 = vweird.f32 %v1708_v20  ;;  %vm808_vm2 = vweird.f32 %v1689_v7 }
 0x30c   : > { %v785_v49 = vsel %vm782_vm1, %v784_v48, %v780_v44  ;;  %v791_v59 = vadd.f32 %v1708_v20, %v790_v43  ;;  %v806_v52 = vadd.f32 %v1689_v7, %v805_v14  ;;  %v798_v46 = vand.u32 2147483648, %v1652_v33 }
 0x30d   : > { %v771_v50 = vmul.f32 %v1613_v54, %v770_v51  ;;  %v813_v53 = vand.u32 2147483648, %v1650_v31  ;;  %vm792_vm11 = vweird.f32 %v1652_v33  ;;  %v796_v57 = vand.u32 2147483647, %v1652_v33 }
 0x30e   : > { %v786_v58 = vmul.f32 %v1609_v38, %v785_v49  ;;  %vm807_vm4 = vweird.f32 %v1650_v31  ;;  %v811_v60 = vand.u32 2147483647, %v1650_v31  ;;  %vm794_vm5 = vmor %vm792_vm11, %vm793_vm14  ;;  %v799_v63 = vor.u32 1.1754944e-38, %v798_v46 }
 0x30f   : > { %829 = vperm.xlu0 %1116, %v741_v2   ;;  %vm809_vm12 = vmor %vm807_vm4, %vm808_vm2  ;;  %v795_v61 = vsel %vm794_vm5, %v1708_v20, %v791_v59  ;;  %v814_v0 = vor.u32 1.1754944e-38, %v813_v53  ;;  %vm797_vm13 = vcmp.eq.f32.partialorder %v796_v57, 8.507059e+37 }
 0x310   : > { %834 = vperm.xlu2 %1117, %v756_v40   ;;  %v810_v54 = vsel %vm809_vm12, %v1689_v7, %v806_v52  ;;  %vm812_vm15 = vcmp.eq.f32.partialorder %v811_v60, 8.507059e+37  ;;  %v800_v33 = vsel %vm797_vm13, %v799_v63, %v795_v61  ;;  %v1186_v7 = vld [vmem:[%s1416_s19 + $0x8] sm:$0xff]  ;;  %v1191_v60 = vld [vmem:[%s1416_s19 + $0x30] sm:$0xff]  ;;  %s939_s19 = scalar_lea.sflag [#allocation5], %s1412_s12 }
 0x311   : > { %v815_v38 = vsel %vm812_vm15, %v814_v0, %v810_v54  ;;  %v801_v25 = vmul.f32 %v1619_v56, %v800_v33 }
 0x312   : > { %v816_v31 = vmul.f32 %v1615_v55, %v815_v38 }
 0x317   : > { %839 = vperm.xlu0 %1116, %v771_v50  }
 0x318   : > { %844 = vperm.xlu2 %1117, %v786_v58  }
 0x31f   : > { %849 = vperm.xlu0 %1116, %v801_v25  }
 0x320   : > { %854 = vperm.xlu2 %1117, %v816_v31  }
 0x362   : > { %v825_v1 = vpop.permute.xlu2 %824 }
 0x363   : > { %v858_v8 = vmul.f32 %v1186_v7, %v825_v1 }
 0x365   : > { %v872_v10 = vsel %vm305_vm0, %v858_v8, 0.0 }
 0x366   : > { %v873_v15 = vrot.slane %v872_v10, 4 }
 0x368   : > { %v874_v26 = vadd.f32 %v873_v15, %v872_v10 }
 0x36a   : > { %v835_v3 = vpop.permute.xlu2 %834  ;;  %v875_v35 = vrot.slane %v874_v26, 2 }
 0x36b   : > { %v860_v56 = vmul.f32 %v1187_v12, %v835_v3 }
 0x36c   : > { %v876_v47 = vadd.f32 %v875_v35, %v874_v26 }
 0x36d   : > { %v886_v19 = vsel %vm305_vm0, %v860_v56, 0.0 }
 0x36e   : > { %v887_v27 = vrot.slane %v886_v19, 4  ;;  %v877_v53 = vrot.slane %v876_v47, 1 }
 0x370   : > { %v888_v2 = vadd.f32 %v887_v27, %v886_v19  ;;  %v878_v1 = vadd.f32 %v877_v53, %v876_v47 }
 0x372   : > { %v845_v4 = vpop.permute.xlu2 %844  ;;  %v889_v14 = vrot.slane %v888_v2, 2 }
 0x373   : > { %v862_v20 = vmul.f32 %v1189_v37, %v845_v4 }
 0x374   : > { %v890_v57 = vadd.f32 %v889_v14, %v888_v2 }
 0x375   : > { %v900_v28 = vsel %vm305_vm0, %v862_v20, 0.0 }
 0x376   : > { %v901_v36 = vrot.slane %v900_v28, 4  ;;  %v891_v3 = vrot.slane %v890_v57, 1 }
 0x378   : > { %v902_v48 = vadd.f32 %v901_v36, %v900_v28  ;;  %v892_v10 = vadd.f32 %v891_v3, %v890_v57 }
 0x379   : > { %v820_v62 = vpop.permute.xlu0 %819 }
 0x37a   : > { %v857_v6 = vmul.f32 %v1185_v5, %v820_v62  ;;  %v855_v16 = vpop.permute.xlu2 %854  ;;  %v903_v58 = vrot.slane %v902_v48, 2 }
 0x37b   : > { %v864_v22 = vmul.f32 %v855_v16, %v1436_v17 }
 0x37c   : > { %v865_v9 = vsel %vm305_vm0, %v857_v6, 0.0  ;;  %v904_v4 = vadd.f32 %v903_v58, %v902_v48 }
 0x37d   : > { %v866_v13 = vrot.slane %v865_v9, 4  ;;  %v914_v32 = vsel %vm305_vm0, %v864_v22, 0.0 }
 0x37e   : > { %v915_v41 = vrot.slane %v914_v32, 4  ;;  %v905_v12 = vrot.slane %v904_v4, 1 }
 0x37f   : > { %v867_v45 = vadd.f32 %v866_v13, %v865_v9 }
 0x380   : > { %v916_v49 = vadd.f32 %v915_v41, %v914_v32 }
 0x381   : > { %v830_v55 = vpop.permute.xlu0 %829  ;;  %v868_v30 = vrot.slane %v867_v45, 2 }
 0x382   : > { %v859_v11 = vmul.f32 %v1188_v18, %v830_v55  ;;  %v917_v63 = vrot.slane %v916_v49, 2  ;;  %v906_v18 = vadd.f32 %v905_v12, %v904_v4 }
 0x383   : > { %v869_v42 = vadd.f32 %v868_v30, %v867_v45 }
 0x384   : > { %v879_v21 = vsel %vm305_vm0, %v859_v11, 0.0  ;;  %v918_v5 = vadd.f32 %v917_v63, %v916_v49 }
 0x385   : > { %v880_v23 = vrot.slane %v879_v21, 4  ;;  %v870_v59 = vrot.slane %v869_v42, 1 }
 0x386   : > { %v919_v13 = vrot.slane %v918_v5, 1 }
 0x387   : > { %v881_v29 = vadd.f32 %v880_v23, %v879_v21  ;;  %v871_v0 = vadd.f32 %v870_v59, %v869_v42 }
 0x388   : > { %v920_v19 = vadd.f32 %v919_v13, %v918_v5 }
 0x389   : > { %v882_v24 = vrot.slane %v881_v29, 2  ;;  %v840_v34 = vpop.permute.xlu0 %839  ;;  %v929_v6 = vsel %vm569_vm6, %v878_v1, %v871_v0  ;;  %vm1835_vm6 = vcmask 1046534  }
 0x38a   : > { %v861_v40 = vmul.f32 %v1190_v39, %v840_v34 }
 0x38b   : > { %v883_v43 = vadd.f32 %v882_v24, %v881_v29 }
 0x38c   : > { %v893_v17 = vsel %vm305_vm0, %v861_v40, 0.0 }
 0x38d   : > { %v894_v44 = vrot.slane %v893_v17, 4  ;;  %v884_v52 = vrot.slane %v883_v43, 1 }
 0x38f   : > { %v895_v51 = vadd.f32 %v894_v44, %v893_v17  ;;  %v885_v38 = vadd.f32 %v884_v52, %v883_v43 }
 0x391   : > { %v896_v46 = vrot.slane %v895_v51, 2  ;;  %v850_v50 = vpop.permute.xlu0 %849  ;;  %v930_v7 = vsel %vm571_vm3, %v885_v38, %v929_v6  ;;  %vm1836_vm3 = vcmask 1047559  }
 0x392   : > { %v863_v61 = vmul.f32 %v1191_v60, %v850_v50  ;;  %v931_v55 = vsel %vm573_vm7, %v892_v10, %v930_v7 }
 0x393   : > { %v897_v54 = vadd.f32 %v896_v46, %v895_v51 }
 0x394   : > { %v907_v33 = vsel %vm305_vm0, %v863_v61, 0.0 }
 0x395   : > { %v898_v25 = vrot.slane %v897_v54, 1  ;;  %v908_v31 = vrot.slane %v907_v33, 4 }
 0x397   : > { %v909_v62 = vadd.f32 %v908_v31, %v907_v33  ;;  %v899_v8 = vadd.f32 %v898_v25, %v897_v54 }
 0x399   : > { %v910_v9 = vrot.slane %v909_v62, 2  ;;  %v932_v15 = vsel %vm575_vm8, %v899_v8, %v931_v55 }
 0x39a   : > { %v933_v37 = vsel %vm577_vm9, %v906_v18, %v932_v15 }
 0x39b   : > { %v911_v56 = vadd.f32 %v910_v9, %v909_v62 }
 0x39d   : > { %v912_v16 = vrot.slane %v911_v56, 1 }
 0x39f   : > { %v913_v11 = vadd.f32 %v912_v16, %v911_v56 }
 0x3a1   : > { %v934_v20 = vsel %vm1835_vm6, %v913_v11, %v933_v37 }
 0x3a2   : > { %v935_v45 = vsel %vm1836_vm3, %v920_v19, %v934_v20 }
 0x3a3   : > { %937 = vst.msk [vmem:[%s246_s4] sm:$0xff] %vm305_vm0, %v935_v45 }
 0x3a4   : > { %1249 = shalt.err (!%p1246_p4)
}
 0x3a5   : > { %1068 = dma.vmem_to_hbm [thread:$0]  (%p1376_p11), %s952_s13, 128, %s954_s15, %s939_s19  }
 0x3a6 PF: > { %s965_s12 = sand.u32 1, %s1276_s20   ;;  %p1837_p7 = scmp.ge.s32.totalorder %s1288_s23, 2 }
 0x3a7   : > { %s966_s27 = scalar_lea.sflag [#allocation5], %s965_s12 }
 0x3a8   : > { %p1075_p5 = pnand %p1837_p7, %p1380_p12 }
 0x3aa   : > { %p1076_p8 = pneg %p1075_p5 }
 0x3ac   : > { %1271 = dma.done.wait (%p1076_p8), %s966_s27, 128  }
 0x3ad   : > { %1273 = vsyncadd (%p1076_p8), %s966_s27, 4294967168  ;;  %p20_p10 = scmp.ge.s32.totalorder %s1351_s25, 4   ;;  %s1838_s20 = smov %s1280_s21 }
 0x3ae   : > { %s1839_s21 = smov %s1284_s22  ;;  %s1840_s22 = smov %s1363_s28 }
 0x3af   : > { %s1841_s23 = smov %s1351_s25  ;;  %22 = sbr.rel (!%p20_p10) target bundleno = 8 (0x8), region = 85 }
 0x3b4   :  { %972 = vsyncpa [#allocation4], 1 }
 0x3b5   :  { %974 = vsyncpa [#allocation4 + $0x1], 1 }
 0x3b6   :  { %975 = vsyncpa [#allocation5], 1 }
 0x3b7   :  { %977 = vsyncpa [#allocation5 + $0x1], 1 }

</bundles_post_ra>
